<compile_context>
chip_gen: v7x
topology: tpu7x:2x2x1
jax: 0.10.0
libtpu: 0.0.40
codegen_flags: <defaults>
</compile_context>

<pallas_src>
import functools

import jax
import jax.numpy as jnp
from jax.experimental import pallas as pl
from jax.experimental.pallas import tpu as pltpu


# Architecture constants (match Actor.__init__).
K1, S1, C1 = 5, 4, 16      # conv1: kernel, stride, out channels
K2, S2, C2 = 3, 3, 32      # conv2
K3, S3, C3 = 3, 3, 32      # conv3
FC1 = 64                   # hidden width of the first Linear


def _round8(n):
    return -(-n // 8) * 8


def _pack_layout(cin, act_dim):
    """Row offsets / total rows / lane width of the packed weight buffer."""
    rows = [K1 * K1 * cin, K2 * K2 * C1, K3 * K3 * C2, C3, FC1]
    width = max(C1, C2, C3, FC1, act_dim)
    offs, off = [], 0
    for r in rows:
        offs.append(off)
        off += _round8(r)              # keep every weight slice sublane-aligned
    return tuple(offs), off, width


def _actor_fused_kernel(p1_ref, w_ref, b_ref, o_ref, *, batch, cin, act_dim):
    """Whole Actor forward on VMEM-resident tiles (single grid point)."""
    f32 = jnp.float32
    nb = batch
    (o1, o2, o3, o4, o5), _, _ = _pack_layout(cin, act_dim)
    r1 = K1 * K1 * cin

    # ---- conv1: one (81B x 25C) @ (25C x 16) matmul, bias, ReLU ----
    y1 = jnp.maximum(
        jnp.dot(p1_ref[...], w_ref[o1:o1 + r1, 0:C1],
                preferred_element_type=f32) + b_ref[0:1, 0:C1], 0.0)
    # y1 row order: q*(9B) + p*B + b   (q = conv2 kernel tap, p = conv2 out pos)

    # ---- conv2 as a sum over its 9 kernel taps (9 tiny K=16 matmuls on the
    #      MXU; no lane-strip scratch writes, everything stays in vregs) ----
    acc2 = jnp.dot(y1[0:9 * nb, :], w_ref[o2:o2 + C1, 0:C2],
                   preferred_element_type=f32)
    for q in range(1, 9):
        acc2 = acc2 + jnp.dot(
            y1[q * 9 * nb:(q + 1) * 9 * nb, :],
            w_ref[o2 + q * C1:o2 + (q + 1) * C1, 0:C2],
            preferred_element_type=f32)
    y2 = jnp.maximum(acc2 + b_ref[1:2, 0:C2], 0.0)       # rows: p*B + b

    # ---- conv3 (1x1 spatial output) the same way over its 9 taps ----
    acc3 = jnp.dot(y2[0:nb, :], w_ref[o3:o3 + C2, 0:C3],
                   preferred_element_type=f32)
    for p in range(1, 9):
        acc3 = acc3 + jnp.dot(
            y2[p * nb:(p + 1) * nb, :],
            w_ref[o3 + p * C2:o3 + (p + 1) * C2, 0:C3],
            preferred_element_type=f32)
    y3 = jnp.maximum(acc3 + b_ref[2:3, 0:C3], 0.0)       # (B, 32) == FC input

    # ---- fc head ----
    h = jnp.maximum(
        jnp.dot(y3, w_ref[o4:o4 + C3, 0:FC1],
                preferred_element_type=f32) + b_ref[3:4, 0:FC1], 0.0)
    o_ref[...] = jnp.tanh(
        jnp.dot(h, w_ref[o5:o5 + FC1, 0:act_dim],
                preferred_element_type=f32) + b_ref[4:5, 0:act_dim])


def _im2col(x, k, s):
    """x: (B,H,W,C) -> (B,OH,OW,k*k*C), patch flatten order (kh, kw, c)."""
    B, H, W, C = x.shape
    OH = (H - k) // s + 1
    OW = (W - k) // s + 1
    cols = []
    for kh in range(k):
        for kw in range(k):
            cols.append(x[:, kh:kh + s * OH:s, kw:kw + s * OW:s, :])
    patches = jnp.stack(cols, axis=3)          # (B, OH, OW, k*k, C)
    return patches.reshape(B, OH, OW, k * k * C), OH, OW


def pack_params(params):
    """One-time packing of the 10 torch tensors into 2 kernel operands.

    Weights are stored as (kh*kw*Cin, Cout) == torch (Cout,Cin,kh,kw) permuted
    to (kh,kw,Cin,Cout) and reshaped; FC weights are torch weight.T.  They are
    stacked at sublane-aligned row offsets into one lane-padded buffer; the 5
    bias vectors become the 5 rows of a second small buffer.
    """
    cin = params["w1"].shape[0] // (K1 * K1)
    act_dim = params["fw2"].shape[1]
    offs, total_rows, width = _pack_layout(cin, act_dim)

    wpack = jnp.zeros((total_rows, width), jnp.float32)
    for off, name in zip(offs, ("w1", "w2", "w3", "fw1", "fw2")):
        w = params[name]
        wpack = wpack.at[off:off + w.shape[0], 0:w.shape[1]].set(w)

    bpack = jnp.zeros((5, width), jnp.float32)
    for i, name in enumerate(("b1", "b2", "b3", "fb1", "fb2")):
        b = params[name]
        bpack = bpack.at[i, 0:b.shape[0]].set(b)
    return wpack, bpack


def actor_forward(wpack, bpack, x, *, action_dim):
    """x: (B, H, W, C) float32.  Returns (B, action_dim) in [-1, 1]."""
    B, H, W, C = x.shape
    pat, OH1, OW1 = _im2col(x, K1, S1)                 # (B, 9, 9, 25*C)
    # Hard requirement: conv1 output 9x9 (e.g. 37x37 inputs) so conv2/conv3
    # (stride == kernel == 3) reduce it to 3x3 then 1x1, making the torch
    # NCHW flatten the identity on the (B, 32) conv3 output.
    assert OH1 == 9 and OW1 == 9, "fused Actor kernel expects a 9x9 conv1 output"

    # Reorder patch rows to (q = kh2*3+kw2, p = oh2*3+ow2, b):
    #   row = q*(9*B) + p*B + b
    pat6 = pat.reshape(B, 3, 3, 3, 3, K1 * K1 * C)     # (b, oh2, kh2, ow2, kw2, d)
    patches1 = jnp.transpose(pat6, (2, 4, 1, 3, 0, 5)).reshape(81 * B, K1 * K1 * C)

    flops = 2 * (81 * B * (K1 * K1 * C) * C1
                 + 9 * B * (9 * C1) * C2
                 + B * (9 * C2) * C3
                 + B * C3 * FC1
                 + B * FC1 * action_dim)
    bytes_accessed = 4 * (patches1.size + wpack.size + bpack.size + B * action_dim)

    vmem = pl.BlockSpec(memory_space=pltpu.MemorySpace.VMEM)
    kernel = functools.partial(_actor_fused_kernel, batch=B, cin=C,
                               act_dim=action_dim)
    # NOTE: no grid — at B=2 everything is a single VMEM-resident block and the
    # kernel is launch-latency bound.  See TODO(synk) at top for large-B scaling.
    return pl.pallas_call(
        kernel,
        out_shape=jax.ShapeDtypeStruct((B, action_dim), jnp.float32),
        in_specs=[vmem, vmem, vmem],
        out_specs=vmem,
        cost_estimate=pl.CostEstimate(flops=flops,
                                      transcendentals=B * action_dim,
                                      bytes_accessed=bytes_accessed),
    )(patches1, wpack, bpack)


# ----------------------------------------------------------------------------
# Parameter init + pure-JAX reference (for the numerical sanity check).
# ----------------------------------------------------------------------------
def _conv_out_size(h, w):
    oh, ow = (h - K1) // S1 + 1, (w - K1) // S1 + 1
    oh, ow = (oh - K2) // S2 + 1, (ow - K2) // S2 + 1
    oh, ow = (oh - K3) // S3 + 1, (ow - K3) // S3 + 1
    return C3 * oh * ow


def init_params(key, input_shape, action_dim):
    """Deterministic synthetic weights, shapes matching Actor.__init__."""
    h, w, c = input_shape
    keys = jax.random.split(key, 10)

    def u(k, shape, fan_in):
        bound = 1.0 / (fan_in ** 0.5)
        return jax.random.uniform(k, shape, jnp.float32, -bound, bound)

    conv_out = _conv_out_size(h, w)
    return {
        "w1": u(keys[0], (K1 * K1 * c, C1), K1 * K1 * c),
        "b1": u(keys[1], (C1,), K1 * K1 * c),
        "w2": u(keys[2], (K2 * K2 * C1, C2), K2 * K2 * C1),
        "b2": u(keys[3], (C2,), K2 * K2 * C1),
        "w3": u(keys[4], (K3 * K3 * C2, C3), K3 * K3 * C2),
        "b3": u(keys[5], (C3,), K3 * K3 * C2),
        "fw1": u(keys[6], (conv_out, FC1), conv_out),
        "fb1": u(keys[7], (FC1,), conv_out),
        "fw2": u(keys[8], (FC1, action_dim), FC1),
        "fb2": u(keys[9], (action_dim,), FC1),
    }


def actor_forward_ref(params, x):
    """Plain-JAX reference (same math, layer-by-layer)."""
    B = x.shape[0]

    def conv_relu(x, w, b, k, s, cout):
        pat, OH, OW = _im2col(x, k, s)
        y = jnp.maximum(pat.reshape(B * OH * OW, -1) @ w + b, 0.0)
        return y.reshape(B, OH, OW, cout)

    y = conv_relu(x, params["w1"], params["b1"], K1, S1, C1)
    y = conv_relu(y, params["w2"], params["b2"], K2, S2, C2)
    y = conv_relu(y, params["w3"], params["b3"], K3, S3, C3)
    y = jnp.transpose(y, (0, 3, 1, 2)).reshape(B, -1)     # torch NCHW flatten
    y = jnp.maximum(y @ params["fw1"] + params["fb1"], 0.0)
    return jnp.tanh(y @ params["fw2"] + params["fb2"])


if __name__ == "__main__":
    # (H, W, C): conv stack maps spatial 37 -> 9 -> 3 -> 1, so conv_out = 32.
    input_shape = (37, 37, 4)
    action_dim = 8
    batch = 2

    key = jax.random.PRNGKey(0)
    pkey, xkey = jax.random.split(key)
    params = init_params(pkey, input_shape, action_dim)
    x = jax.random.normal(xkey, (batch,) + input_shape, dtype=jnp.float32)

    wpack, bpack = pack_params(params)     # one-time packing, outside the jit

    fwd = jax.jit(functools.partial(actor_forward, action_dim=action_dim))
    out = jax.block_until_ready(fwd(wpack, bpack, x))

    assert out.shape == (batch, action_dim)
    assert bool(jnp.all(jnp.abs(out) <= 1.0))             # tanh range check

    ref = actor_forward_ref(params, x)
    err = float(jnp.max(jnp.abs(out - ref)))
    assert err < 1e-4, f"mismatch vs reference: {err}"

    print("KERNEL_OK")
</pallas_src>

<mosaic_0001>
module attributes {stable_mosaic.version = 11 : i64} {
  func.func @_actor_fused_kernel(%arg0: memref<162x100xf32, #tpu.memory_space<vmem>>, %arg1: memref<632x64xf32, #tpu.memory_space<vmem>>, %arg2: memref<5x64xf32, #tpu.memory_space<vmem>>, %arg3: memref<2x8xf32, #tpu.memory_space<vmem>>) attributes {dimension_semantics = [], scalar_prefetch = 0 : i64, scratch_operands = 0 : i64, tpu.core_type = #tpu.core_type<tc>} {
    %c0 = arith.constant 0 : index
    %c0_0 = arith.constant 0 : index
    %0 = vector.load %arg0[%c0, %c0_0] : memref<162x100xf32, #tpu.memory_space<vmem>>, vector<162x100xf32>
    %c0_1 = arith.constant 0 : index
    %c0_2 = arith.constant 0 : index
    %1 = vector.load %arg1[%c0_1, %c0_2] : memref<632x64xf32, #tpu.memory_space<vmem>>, vector<100x16xf32>
    %cst = arith.constant dense<0.000000e+00> : vector<162x16xf32>
    %2 = tpu.matmul %0, %1, %cst {dimension_numbers = #tpu.dot_dimension_numbers<[1], [0], [0], [1], [0, 0, 1, 1], [], []>} : vector<162x100xf32>, vector<100x16xf32>, vector<162x16xf32> -> vector<162x16xf32>
    %c0_3 = arith.constant 0 : index
    %c0_4 = arith.constant 0 : index
    %3 = vector.load %arg2[%c0_3, %c0_4] : memref<5x64xf32, #tpu.memory_space<vmem>>, vector<1x16xf32>
    %4 = vector.broadcast %3 : vector<1x16xf32> to vector<162x16xf32>
    %5 = arith.addf %2, %4 : vector<162x16xf32>
    %cst_5 = arith.constant 0.000000e+00 : f32
    %6 = vector.broadcast %cst_5 : f32 to vector<162x16xf32>
    %7 = arith.maximumf %5, %6 : vector<162x16xf32>
    %8 = vector.extract_strided_slice %7 {offsets = [0, 0], sizes = [18, 16], strides = [1, 1]} : vector<162x16xf32> to vector<18x16xf32>
    %c104 = arith.constant 104 : index
    %c0_6 = arith.constant 0 : index
    %9 = vector.load %arg1[%c104, %c0_6] : memref<632x64xf32, #tpu.memory_space<vmem>>, vector<16x32xf32>
    %cst_7 = arith.constant dense<0.000000e+00> : vector<18x32xf32>
    %10 = tpu.matmul %8, %9, %cst_7 {dimension_numbers = #tpu.dot_dimension_numbers<[1], [0], [0], [1], [0, 0, 1, 1], [], []>} : vector<18x16xf32>, vector<16x32xf32>, vector<18x32xf32> -> vector<18x32xf32>
    %11 = vector.extract_strided_slice %7 {offsets = [18, 0], sizes = [18, 16], strides = [1, 1]} : vector<162x16xf32> to vector<18x16xf32>
    %c120 = arith.constant 120 : index
    %c0_8 = arith.constant 0 : index
    %12 = vector.load %arg1[%c120, %c0_8] : memref<632x64xf32, #tpu.memory_space<vmem>>, vector<16x32xf32>
    %cst_9 = arith.constant dense<0.000000e+00> : vector<18x32xf32>
    %13 = tpu.matmul %11, %12, %cst_9 {dimension_numbers = #tpu.dot_dimension_numbers<[1], [0], [0], [1], [0, 0, 1, 1], [], []>} : vector<18x16xf32>, vector<16x32xf32>, vector<18x32xf32> -> vector<18x32xf32>
    %14 = arith.addf %10, %13 : vector<18x32xf32>
    %15 = vector.extract_strided_slice %7 {offsets = [36, 0], sizes = [18, 16], strides = [1, 1]} : vector<162x16xf32> to vector<18x16xf32>
    %c136 = arith.constant 136 : index
    %c0_10 = arith.constant 0 : index
    %16 = vector.load %arg1[%c136, %c0_10] : memref<632x64xf32, #tpu.memory_space<vmem>>, vector<16x32xf32>
    %cst_11 = arith.constant dense<0.000000e+00> : vector<18x32xf32>
    %17 = tpu.matmul %15, %16, %cst_11 {dimension_numbers = #tpu.dot_dimension_numbers<[1], [0], [0], [1], [0, 0, 1, 1], [], []>} : vector<18x16xf32>, vector<16x32xf32>, vector<18x32xf32> -> vector<18x32xf32>
    %18 = arith.addf %14, %17 : vector<18x32xf32>
    %19 = vector.extract_strided_slice %7 {offsets = [54, 0], sizes = [18, 16], strides = [1, 1]} : vector<162x16xf32> to vector<18x16xf32>
    %c152 = arith.constant 152 : index
    %c0_12 = arith.constant 0 : index
    %20 = vector.load %arg1[%c152, %c0_12] : memref<632x64xf32, #tpu.memory_space<vmem>>, vector<16x32xf32>
    %cst_13 = arith.constant dense<0.000000e+00> : vector<18x32xf32>
    %21 = tpu.matmul %19, %20, %cst_13 {dimension_numbers = #tpu.dot_dimension_numbers<[1], [0], [0], [1], [0, 0, 1, 1], [], []>} : vector<18x16xf32>, vector<16x32xf32>, vector<18x32xf32> -> vector<18x32xf32>
    %22 = arith.addf %18, %21 : vector<18x32xf32>
    %23 = vector.extract_strided_slice %7 {offsets = [72, 0], sizes = [18, 16], strides = [1, 1]} : vector<162x16xf32> to vector<18x16xf32>
    %c168 = arith.constant 168 : index
    %c0_14 = arith.constant 0 : index
    %24 = vector.load %arg1[%c168, %c0_14] : memref<632x64xf32, #tpu.memory_space<vmem>>, vector<16x32xf32>
    %cst_15 = arith.constant dense<0.000000e+00> : vector<18x32xf32>
    %25 = tpu.matmul %23, %24, %cst_15 {dimension_numbers = #tpu.dot_dimension_numbers<[1], [0], [0], [1], [0, 0, 1, 1], [], []>} : vector<18x16xf32>, vector<16x32xf32>, vector<18x32xf32> -> vector<18x32xf32>
    %26 = arith.addf %22, %25 : vector<18x32xf32>
    %27 = vector.extract_strided_slice %7 {offsets = [90, 0], sizes = [18, 16], strides = [1, 1]} : vector<162x16xf32> to vector<18x16xf32>
    %c184 = arith.constant 184 : index
    %c0_16 = arith.constant 0 : index
    %28 = vector.load %arg1[%c184, %c0_16] : memref<632x64xf32, #tpu.memory_space<vmem>>, vector<16x32xf32>
    %cst_17 = arith.constant dense<0.000000e+00> : vector<18x32xf32>
    %29 = tpu.matmul %27, %28, %cst_17 {dimension_numbers = #tpu.dot_dimension_numbers<[1], [0], [0], [1], [0, 0, 1, 1], [], []>} : vector<18x16xf32>, vector<16x32xf32>, vector<18x32xf32> -> vector<18x32xf32>
    %30 = arith.addf %26, %29 : vector<18x32xf32>
    %31 = vector.extract_strided_slice %7 {offsets = [108, 0], sizes = [18, 16], strides = [1, 1]} : vector<162x16xf32> to vector<18x16xf32>
    %c200 = arith.constant 200 : index
    %c0_18 = arith.constant 0 : index
    %32 = vector.load %arg1[%c200, %c0_18] : memref<632x64xf32, #tpu.memory_space<vmem>>, vector<16x32xf32>
    %cst_19 = arith.constant dense<0.000000e+00> : vector<18x32xf32>
    %33 = tpu.matmul %31, %32, %cst_19 {dimension_numbers = #tpu.dot_dimension_numbers<[1], [0], [0], [1], [0, 0, 1, 1], [], []>} : vector<18x16xf32>, vector<16x32xf32>, vector<18x32xf32> -> vector<18x32xf32>
    %34 = arith.addf %30, %33 : vector<18x32xf32>
    %35 = vector.extract_strided_slice %7 {offsets = [126, 0], sizes = [18, 16], strides = [1, 1]} : vector<162x16xf32> to vector<18x16xf32>
    %c216 = arith.constant 216 : index
    %c0_20 = arith.constant 0 : index
    %36 = vector.load %arg1[%c216, %c0_20] : memref<632x64xf32, #tpu.memory_space<vmem>>, vector<16x32xf32>
    %cst_21 = arith.constant dense<0.000000e+00> : vector<18x32xf32>
    %37 = tpu.matmul %35, %36, %cst_21 {dimension_numbers = #tpu.dot_dimension_numbers<[1], [0], [0], [1], [0, 0, 1, 1], [], []>} : vector<18x16xf32>, vector<16x32xf32>, vector<18x32xf32> -> vector<18x32xf32>
    %38 = arith.addf %34, %37 : vector<18x32xf32>
    %39 = vector.extract_strided_slice %7 {offsets = [144, 0], sizes = [18, 16], strides = [1, 1]} : vector<162x16xf32> to vector<18x16xf32>
    %c232 = arith.constant 232 : index
    %c0_22 = arith.constant 0 : index
    %40 = vector.load %arg1[%c232, %c0_22] : memref<632x64xf32, #tpu.memory_space<vmem>>, vector<16x32xf32>
    %cst_23 = arith.constant dense<0.000000e+00> : vector<18x32xf32>
    %41 = tpu.matmul %39, %40, %cst_23 {dimension_numbers = #tpu.dot_dimension_numbers<[1], [0], [0], [1], [0, 0, 1, 1], [], []>} : vector<18x16xf32>, vector<16x32xf32>, vector<18x32xf32> -> vector<18x32xf32>
    %42 = arith.addf %38, %41 : vector<18x32xf32>
    %c1 = arith.constant 1 : index
    %c0_24 = arith.constant 0 : index
    %43 = vector.load %arg2[%c1, %c0_24] : memref<5x64xf32, #tpu.memory_space<vmem>>, vector<1x32xf32>
    %44 = vector.broadcast %43 : vector<1x32xf32> to vector<18x32xf32>
    %45 = arith.addf %42, %44 : vector<18x32xf32>
    %cst_25 = arith.constant 0.000000e+00 : f32
    %46 = vector.broadcast %cst_25 : f32 to vector<18x32xf32>
    %47 = arith.maximumf %45, %46 : vector<18x32xf32>
    %48 = vector.extract_strided_slice %47 {offsets = [0, 0], sizes = [2, 32], strides = [1, 1]} : vector<18x32xf32> to vector<2x32xf32>
    %c248 = arith.constant 248 : index
    %c0_26 = arith.constant 0 : index
    %49 = vector.load %arg1[%c248, %c0_26] : memref<632x64xf32, #tpu.memory_space<vmem>>, vector<32x32xf32>
    %cst_27 = arith.constant dense<0.000000e+00> : vector<2x32xf32>
    %50 = tpu.matmul %48, %49, %cst_27 {dimension_numbers = #tpu.dot_dimension_numbers<[1], [0], [0], [1], [0, 0, 1, 1], [], []>} : vector<2x32xf32>, vector<32x32xf32>, vector<2x32xf32> -> vector<2x32xf32>
    %51 = vector.extract_strided_slice %47 {offsets = [2, 0], sizes = [2, 32], strides = [1, 1]} : vector<18x32xf32> to vector<2x32xf32>
    %c280 = arith.constant 280 : index
    %c0_28 = arith.constant 0 : index
    %52 = vector.load %arg1[%c280, %c0_28] : memref<632x64xf32, #tpu.memory_space<vmem>>, vector<32x32xf32>
    %cst_29 = arith.constant dense<0.000000e+00> : vector<2x32xf32>
    %53 = tpu.matmul %51, %52, %cst_29 {dimension_numbers = #tpu.dot_dimension_numbers<[1], [0], [0], [1], [0, 0, 1, 1], [], []>} : vector<2x32xf32>, vector<32x32xf32>, vector<2x32xf32> -> vector<2x32xf32>
    %54 = arith.addf %50, %53 : vector<2x32xf32>
    %55 = vector.extract_strided_slice %47 {offsets = [4, 0], sizes = [2, 32], strides = [1, 1]} : vector<18x32xf32> to vector<2x32xf32>
    %c312 = arith.constant 312 : index
    %c0_30 = arith.constant 0 : index
    %56 = vector.load %arg1[%c312, %c0_30] : memref<632x64xf32, #tpu.memory_space<vmem>>, vector<32x32xf32>
    %cst_31 = arith.constant dense<0.000000e+00> : vector<2x32xf32>
    %57 = tpu.matmul %55, %56, %cst_31 {dimension_numbers = #tpu.dot_dimension_numbers<[1], [0], [0], [1], [0, 0, 1, 1], [], []>} : vector<2x32xf32>, vector<32x32xf32>, vector<2x32xf32> -> vector<2x32xf32>
    %58 = arith.addf %54, %57 : vector<2x32xf32>
    %59 = vector.extract_strided_slice %47 {offsets = [6, 0], sizes = [2, 32], strides = [1, 1]} : vector<18x32xf32> to vector<2x32xf32>
    %c344 = arith.constant 344 : index
    %c0_32 = arith.constant 0 : index
    %60 = vector.load %arg1[%c344, %c0_32] : memref<632x64xf32, #tpu.memory_space<vmem>>, vector<32x32xf32>
    %cst_33 = arith.constant dense<0.000000e+00> : vector<2x32xf32>
    %61 = tpu.matmul %59, %60, %cst_33 {dimension_numbers = #tpu.dot_dimension_numbers<[1], [0], [0], [1], [0, 0, 1, 1], [], []>} : vector<2x32xf32>, vector<32x32xf32>, vector<2x32xf32> -> vector<2x32xf32>
    %62 = arith.addf %58, %61 : vector<2x32xf32>
    %63 = vector.extract_strided_slice %47 {offsets = [8, 0], sizes = [2, 32], strides = [1, 1]} : vector<18x32xf32> to vector<2x32xf32>
    %c376 = arith.constant 376 : index
    %c0_34 = arith.constant 0 : index
    %64 = vector.load %arg1[%c376, %c0_34] : memref<632x64xf32, #tpu.memory_space<vmem>>, vector<32x32xf32>
    %cst_35 = arith.constant dense<0.000000e+00> : vector<2x32xf32>
    %65 = tpu.matmul %63, %64, %cst_35 {dimension_numbers = #tpu.dot_dimension_numbers<[1], [0], [0], [1], [0, 0, 1, 1], [], []>} : vector<2x32xf32>, vector<32x32xf32>, vector<2x32xf32> -> vector<2x32xf32>
    %66 = arith.addf %62, %65 : vector<2x32xf32>
    %67 = vector.extract_strided_slice %47 {offsets = [10, 0], sizes = [2, 32], strides = [1, 1]} : vector<18x32xf32> to vector<2x32xf32>
    %c408 = arith.constant 408 : index
    %c0_36 = arith.constant 0 : index
    %68 = vector.load %arg1[%c408, %c0_36] : memref<632x64xf32, #tpu.memory_space<vmem>>, vector<32x32xf32>
    %cst_37 = arith.constant dense<0.000000e+00> : vector<2x32xf32>
    %69 = tpu.matmul %67, %68, %cst_37 {dimension_numbers = #tpu.dot_dimension_numbers<[1], [0], [0], [1], [0, 0, 1, 1], [], []>} : vector<2x32xf32>, vector<32x32xf32>, vector<2x32xf32> -> vector<2x32xf32>
    %70 = arith.addf %66, %69 : vector<2x32xf32>
    %71 = vector.extract_strided_slice %47 {offsets = [12, 0], sizes = [2, 32], strides = [1, 1]} : vector<18x32xf32> to vector<2x32xf32>
    %c440 = arith.constant 440 : index
    %c0_38 = arith.constant 0 : index
    %72 = vector.load %arg1[%c440, %c0_38] : memref<632x64xf32, #tpu.memory_space<vmem>>, vector<32x32xf32>
    %cst_39 = arith.constant dense<0.000000e+00> : vector<2x32xf32>
    %73 = tpu.matmul %71, %72, %cst_39 {dimension_numbers = #tpu.dot_dimension_numbers<[1], [0], [0], [1], [0, 0, 1, 1], [], []>} : vector<2x32xf32>, vector<32x32xf32>, vector<2x32xf32> -> vector<2x32xf32>
    %74 = arith.addf %70, %73 : vector<2x32xf32>
    %75 = vector.extract_strided_slice %47 {offsets = [14, 0], sizes = [2, 32], strides = [1, 1]} : vector<18x32xf32> to vector<2x32xf32>
    %c472 = arith.constant 472 : index
    %c0_40 = arith.constant 0 : index
    %76 = vector.load %arg1[%c472, %c0_40] : memref<632x64xf32, #tpu.memory_space<vmem>>, vector<32x32xf32>
    %cst_41 = arith.constant dense<0.000000e+00> : vector<2x32xf32>
    %77 = tpu.matmul %75, %76, %cst_41 {dimension_numbers = #tpu.dot_dimension_numbers<[1], [0], [0], [1], [0, 0, 1, 1], [], []>} : vector<2x32xf32>, vector<32x32xf32>, vector<2x32xf32> -> vector<2x32xf32>
    %78 = arith.addf %74, %77 : vector<2x32xf32>
    %79 = vector.extract_strided_slice %47 {offsets = [16, 0], sizes = [2, 32], strides = [1, 1]} : vector<18x32xf32> to vector<2x32xf32>
    %c504 = arith.constant 504 : index
    %c0_42 = arith.constant 0 : index
    %80 = vector.load %arg1[%c504, %c0_42] : memref<632x64xf32, #tpu.memory_space<vmem>>, vector<32x32xf32>
    %cst_43 = arith.constant dense<0.000000e+00> : vector<2x32xf32>
    %81 = tpu.matmul %79, %80, %cst_43 {dimension_numbers = #tpu.dot_dimension_numbers<[1], [0], [0], [1], [0, 0, 1, 1], [], []>} : vector<2x32xf32>, vector<32x32xf32>, vector<2x32xf32> -> vector<2x32xf32>
    %82 = arith.addf %78, %81 : vector<2x32xf32>
    %c2 = arith.constant 2 : index
    %c0_44 = arith.constant 0 : index
    %83 = vector.load %arg2[%c2, %c0_44] : memref<5x64xf32, #tpu.memory_space<vmem>>, vector<1x32xf32>
    %84 = vector.broadcast %83 : vector<1x32xf32> to vector<2x32xf32>
    %85 = arith.addf %82, %84 : vector<2x32xf32>
    %cst_45 = arith.constant 0.000000e+00 : f32
    %86 = vector.broadcast %cst_45 : f32 to vector<2x32xf32>
    %87 = arith.maximumf %85, %86 : vector<2x32xf32>
    %c536 = arith.constant 536 : index
    %c0_46 = arith.constant 0 : index
    %88 = vector.load %arg1[%c536, %c0_46] : memref<632x64xf32, #tpu.memory_space<vmem>>, vector<32x64xf32>
    %cst_47 = arith.constant dense<0.000000e+00> : vector<2x64xf32>
    %89 = tpu.matmul %87, %88, %cst_47 {dimension_numbers = #tpu.dot_dimension_numbers<[1], [0], [0], [1], [0, 0, 1, 1], [], []>} : vector<2x32xf32>, vector<32x64xf32>, vector<2x64xf32> -> vector<2x64xf32>
    %c3 = arith.constant 3 : index
    %c0_48 = arith.constant 0 : index
    %90 = vector.load %arg2[%c3, %c0_48] : memref<5x64xf32, #tpu.memory_space<vmem>>, vector<1x64xf32>
    %91 = vector.broadcast %90 : vector<1x64xf32> to vector<2x64xf32>
    %92 = arith.addf %89, %91 : vector<2x64xf32>
    %cst_49 = arith.constant 0.000000e+00 : f32
    %93 = vector.broadcast %cst_49 : f32 to vector<2x64xf32>
    %94 = arith.maximumf %92, %93 : vector<2x64xf32>
    %c568 = arith.constant 568 : index
    %c0_50 = arith.constant 0 : index
    %95 = vector.load %arg1[%c568, %c0_50] : memref<632x64xf32, #tpu.memory_space<vmem>>, vector<64x8xf32>
    %cst_51 = arith.constant dense<0.000000e+00> : vector<2x8xf32>
    %96 = tpu.matmul %94, %95, %cst_51 {dimension_numbers = #tpu.dot_dimension_numbers<[1], [0], [0], [1], [0, 0, 1, 1], [], []>} : vector<2x64xf32>, vector<64x8xf32>, vector<2x8xf32> -> vector<2x8xf32>
    %c4 = arith.constant 4 : index
    %c0_52 = arith.constant 0 : index
    %97 = vector.load %arg2[%c4, %c0_52] : memref<5x64xf32, #tpu.memory_space<vmem>>, vector<1x8xf32>
    %98 = vector.broadcast %97 : vector<1x8xf32> to vector<2x8xf32>
    %99 = arith.addf %96, %98 : vector<2x8xf32>
    %100 = math.tanh %99 : vector<2x8xf32>
    %c0_53 = arith.constant 0 : index
    %c0_54 = arith.constant 0 : index
    %101 = vector.load %arg3[%c0_53, %c0_54] : memref<2x8xf32, #tpu.memory_space<vmem>>, vector<2x8xf32>
    tpu.vector_store %arg3[%c0_53, %c0_54], %100 {strides = array<i32>} : memref<2x8xf32, #tpu.memory_space<vmem>>, vector<2x8xf32>,
    return
  }
}

</mosaic_0001>

<bundles_post_ra>
// kernel: actor_forward.1
= control target key start
LH: loop header
LB: loop body
LE: loop exit
PB: predicated region body
PF: predicated region fallthrough
CT: control target
= control target key end

     0   :  { %v2771_v3 = vmov 0.0|0.0   ;;  %vm2772_vm0 = vmmov 0   ;;  %v2773_v6 = vmov 0.0   ;;  %s3409_s0 = inlined_call_operand.vmem [shape: f32[162,100], index: 0, kind: input, shape index: {}]   ;;  %s3410_s1 = inlined_call_operand.vmem [shape: f32[632,64], index: 1, kind: input, shape index: {}]   ;;  %s3411_s2 = inlined_call_operand.vmem [shape: f32[5,64], index: 2, kind: input, shape index: {}]   ;;  %s3412_s3 = inlined_call_operand.hbm [shape: f32[2,8], index: 3, kind: output, shape index: {}]  }
   0x1   :  { %v36_v0 = vld [vmem:[%s3410_s1] sm:$0xff]  ;;  %v37_v1 = vld [vmem:[%s3410_s1 + $0x8] sm:$0xff]  ;;  %v38_v2 = vld [vmem:[%s3410_s1 + $0x10] sm:$0xff]  ;;  %2624 = vmatprep.subr.bf16.mxu0 %v2771_v3  ;;  %2642 = vmatprep.subr.bf16.mxu1 %v2771_v3 }
   0x2   :  { %v2625_v4 = vpack.c.bf16 %v37_v1, %v36_v0  ;;  %v39_v5 = vld [vmem:[%s3410_s1 + $0x18] sm:$0xff]  ;;  %2315 = vmatprep.mubr.msk.f32.mxu0 %vm2772_vm0, %v2773_v6  ;;  %2382 = vmatprep.mubr.msk.f32.mxu1 %vm2772_vm0, %v2773_v6  ;;  %v40_v8 = vld [vmem:[%s3410_s1 + $0x20] sm:$0xff]  ;;  %v41_v9 = vld [vmem:[%s3410_s1 + $0x28] sm:$0xff] }
   0x3   :  { %v2628_v7 = vpack.c.bf16 %v39_v5, %v38_v2  ;;  %v2631_v10 = vpack.c.bf16 %v41_v9, %v40_v8  ;;  %v42_v11 = vld [vmem:[%s3410_s1 + $0x30] sm:$0xff]  ;;  %v43_v12 = vld [vmem:[%s3410_s1 + $0x38] sm:$0xff] }
   0x4   :  { %2626 = vmatpush3.bf16.msra.mxu0 %v2625_v4  ;;  %v2634_v13 = vpack.c.bf16 %v43_v12, %v42_v11 }
   0x5   :  { %2627 = vmatprep.subr.bf16.mxu0 %v2771_v3 }
   0x8   :  { %2629 = vmatpush3.bf16.msra.mxu0 %v2628_v7 }
   0x9   :  { %2630 = vmatprep.subr.bf16.mxu0 %v2771_v3 }
   0xc   :  { %2632 = vmatpush3.bf16.msra.mxu0 %v2631_v10 }
   0xd   :  { %8 = vsyncpa [#allocation3], 0  ;;  %2633 = vmatprep.subr.bf16.mxu0 %v2771_v3  ;;  %v44_v14 = vld [vmem:[%s3410_s1 + $0x40] sm:$0xff]  ;;  %v45_v15 = vld [vmem:[%s3410_s1 + $0x48] sm:$0xff]  ;;  %vm118_vm1 = vcmask 1043456   ;;  %vm54_vm2 = vcmask 818176  }
   0xe   :  { %v2637_v16 = vpack.c.bf16 %v45_v15, %v44_v14  ;;  %v46_v17 = vld [vmem:[%s3410_s1 + $0x50] sm:$0xff]  ;;  %v47_v18 = vld [vmem:[%s3410_s1 + $0x58] sm:$0xff]  ;;  %v48_v20 = vld [vmem:[%s3410_s1 + $0x60] sm:$0xf]  ;;  %vm320_vm3 = vcmask 1045504   ;;  %vm326_vm4 = vcmask 130048  }
   0xf   :  { %v2640_v19 = vpack.c.bf16 %v47_v18, %v46_v17  ;;  %v15_v21 = vld [vmem:[%s3409_s0] sm:$0xff]  ;;  %v16_v22 = vld [vmem:[%s3409_s0 + $0x8] sm:$0xff]  ;;  %v17_v23 = vld [vmem:[%s3409_s0 + $0x10] sm:$0xff]  ;;  %vm603_vm5 = vcmask 1041408   ;;  %vm1201_vm6 = vcmask 261120   ;;  %vm1995_vm7 = vcmask 523264  }
  0x10   :  { %2635 = vmatpush3.bf16.msra.mxu0 %v2634_v13  ;;  %v18_v24 = vld [vmem:[%s3409_s0 + $0x18] sm:$0xff]  ;;  %v19_v25 = vld [vmem:[%s3409_s0 + $0x20] sm:$0xff]  ;;  %v20_v26 = vld [vmem:[%s3409_s0 + $0x28] sm:$0xff]  ;;  %vm2070_vm8 = vcmask 58368  }
  0x11   :  { %2636 = vmatprep.subr.bf16.mxu0 %v2771_v3  ;;  %v21_v27 = vld [vmem:[%s3409_s0 + $0x30] sm:$0xff]  ;;  %v22_v28 = vld [vmem:[%s3409_s0 + $0x38] sm:$0xff]  ;;  %v23_v29 = vld [vmem:[%s3409_s0 + $0x40] sm:$0xff] }
  0x12   :  { %v24_v30 = vld [vmem:[%s3409_s0 + $0x48] sm:$0xff]  ;;  %v25_v31 = vld [vmem:[%s3409_s0 + $0x50] sm:$0xff]  ;;  %v26_v32 = vld [vmem:[%s3409_s0 + $0x58] sm:$0xff] }
  0x13   :  { %v27_v33 = vld [vmem:[%s3409_s0 + $0x60] sm:$0xff]  ;;  %v28_v34 = vld [vmem:[%s3409_s0 + $0x68] sm:$0xff]  ;;  %v29_v35 = vld [vmem:[%s3409_s0 + $0x70] sm:$0xff] }
  0x14   :  { %2638 = vmatpush3.bf16.msra.mxu0 %v2637_v16  ;;  %v30_v36 = vld [vmem:[%s3409_s0 + $0x78] sm:$0xff]  ;;  %v31_v37 = vld [vmem:[%s3409_s0 + $0x80] sm:$0xff]  ;;  %v32_v38 = vld [vmem:[%s3409_s0 + $0x88] sm:$0xff] }
  0x15   :  { %2639 = vmatprep.subr.bf16.mxu0 %v2771_v3  ;;  %v33_v39 = vld [vmem:[%s3409_s0 + $0x90] sm:$0xff]  ;;  %v34_v40 = vld [vmem:[%s3409_s0 + $0x98] sm:$0xff]  ;;  %v35_v41 = vld [vmem:[%s3409_s0 + $0xa0] sm:$0x3] }
  0x16   :  { %v315_v42 = vld [vmem:[%s3410_s1 + $0x78] sm:$0xff]  ;;  %v316_v43 = vld [vmem:[%s3410_s1 + $0x80] sm:$0xff]  ;;  %v313_v57 = vld [vmem:[%s3410_s1 + $0x68] sm:$0xff] }
  0x17   :  { %v2643_v44 = vpack.c.bf16 %v316_v43, %v315_v42  ;;  %v2984_v49 = vld [vmem:[%s3411_s2] ss:$0 sm:$0xff]  ;;  %v314_v58 = vld [vmem:[%s3410_s1 + $0x70] sm:$0xff]  ;;  %v501_v18 = vld [vmem:[%s3410_s1 + $0x88] sm:$0xff] }
  0x18   :  { %2641 = vmatpush3.bf16.msra.mxu0 %v2640_v19  ;;  %v2646_v1 = vpack.c.bf16 %v314_v58, %v313_v57  ;;  %v502_v19 = vld [vmem:[%s3410_s1 + $0x90] sm:$0xff]  ;;  %v599_v42 = vld [vmem:[%s3410_s1 + $0x98] sm:$0xff]  ;;  %v600_v43 = vld [vmem:[%s3410_s1 + $0xa0] sm:$0xff] }
  0x19   :  { %2313 = vmatprep.subr.mxu0 %v2773_v6  ;;  %2644 = vmatpush3.bf16.msra.mxu1 %v2643_v44  ;;  %v699_v57 = vld [vmem:[%s3410_s1 + $0xb0] sm:$0xff] }
  0x1a   :  { %2645 = vmatprep.subr.bf16.mxu1 %v2771_v3 }
  0x1c   :  { %2314 = vmatpush3.msk.msra.mxu0 %vm118_vm1, %v48_v20 }
  0x1d   :  { %2316 = vmatmul.mubr.msk.f32.vlgmr.msra.gmra.mrb[0].mxu0 %vm54_vm2, %v15_v21  ;;  %2681 = vmatprep.subr.bf16.mxu0 %v2771_v3 }
  0x1e   :  { %2318 = vmatprep.mubr.msk.f32.mxu0 %vm2772_vm0, %v2773_v6 }
  0x21   :  { %2319 = vmatmul.mubr.msk.f32.gmra.mrb[2].mxu0 %vm54_vm2, %v16_v22 }
  0x22   :  { %2321 = vmatprep.mubr.msk.f32.mxu0 %vm2772_vm0, %v2773_v6 }
  0x25   :  { %2322 = vmatmul.mubr.msk.f32.gmra.mrb[4].mxu0 %vm54_vm2, %v17_v23  ;;  %v2649_v23 = vpack.c.bf16 %v502_v19, %v501_v18  ;;  %v793_v18 = vld [vmem:[%s3410_s1 + $0xc0] sm:$0xff] }
  0x26   :  { %2324 = vmatprep.mubr.msk.f32.mxu0 %vm2772_vm0, %v2773_v6 }
  0x29   :  { %2325 = vmatmul.mubr.msk.f32.gmra.mrb[6].mxu0 %vm54_vm2, %v18_v24 }
  0x2a   :  { %2327 = vmatprep.mubr.msk.f32.mxu0 %vm2772_vm0, %v2773_v6 }
  0x2d   :  { %2328 = vmatmul.mubr.msk.f32.gmra.mrb[8].mxu0 %vm54_vm2, %v19_v25 }
  0x2e   :  { %2330 = vmatprep.mubr.msk.f32.mxu0 %vm2772_vm0, %v2773_v6 }
  0x31   :  { %2331 = vmatmul.mubr.msk.f32.gmra.mrb[10].mxu0 %vm54_vm2, %v20_v26 }
  0x32   :  { %2333 = vmatprep.mubr.msk.f32.mxu0 %vm2772_vm0, %v2773_v6 }
  0x35   :  { %2334 = vmatmul.mubr.msk.f32.gmra.mrb[12].mxu0 %vm54_vm2, %v21_v27 }
  0x36   :  { %2336 = vmatprep.mubr.msk.f32.mxu0 %vm2772_vm0, %v2773_v6 }
  0x39   :  { %2337 = vmatmul.mubr.msk.f32.gmra.mrb[14].mxu0 %vm54_vm2, %v22_v28 }
  0x3a   :  { %2339 = vmatprep.mubr.msk.f32.mxu0 %vm2772_vm0, %v2773_v6 }
  0x3d   :  { %2340 = vmatmul.mubr.msk.f32.gmra.mrb[16].mxu0 %vm54_vm2, %v23_v29 }
  0x3e   :  { %2342 = vmatprep.mubr.msk.f32.mxu0 %vm2772_vm0, %v2773_v6 }
  0x41   :  { %2343 = vmatmul.mubr.msk.f32.gmra.mrb[18].mxu0 %vm54_vm2, %v24_v30 }
  0x42   :  { %2345 = vmatprep.mubr.msk.f32.mxu0 %vm2772_vm0, %v2773_v6 }
  0x45   :  { %2346 = vmatmul.mubr.msk.f32.gmra.mrb[20].mxu0 %vm54_vm2, %v25_v31 }
  0x46   :  { %2348 = vmatprep.mubr.msk.f32.mxu0 %vm2772_vm0, %v2773_v6 }
  0x49   :  { %2349 = vmatmul.mubr.msk.f32.gmra.mrb[22].mxu0 %vm54_vm2, %v26_v32 }
  0x4a   :  { %2351 = vmatprep.mubr.msk.f32.mxu0 %vm2772_vm0, %v2773_v6 }
  0x4d   :  { %2352 = vmatmul.mubr.msk.f32.gmra.mrb[24].mxu0 %vm54_vm2, %v27_v33 }
  0x4e   :  { %2354 = vmatprep.mubr.msk.f32.mxu0 %vm2772_vm0, %v2773_v6 }
  0x51   :  { %2355 = vmatmul.mubr.msk.f32.gmra.mrb[26].mxu0 %vm54_vm2, %v28_v34 }
  0x52   :  { %2357 = vmatprep.mubr.msk.f32.mxu0 %vm2772_vm0, %v2773_v6 }
  0x55   :  { %2358 = vmatmul.mubr.msk.f32.gmra.mrb[28].mxu0 %vm54_vm2, %v29_v35 }
  0x56   :  { %2360 = vmatprep.mubr.msk.f32.mxu0 %vm2772_vm0, %v2773_v6 }
  0x59   :  { %2361 = vmatmul.mubr.msk.f32.gmra.mrb[30].mxu0 %vm54_vm2, %v30_v36 }
  0x5a   :  { %2363 = vmatprep.mubr.msk.f32.mxu0 %vm2772_vm0, %v2773_v6 }
  0x5d   :  { %2364 = vmatmul.mubr.msk.f32.gmra.mrb[32].mxu0 %vm54_vm2, %v31_v37 }
  0x5e   :  { %2366 = vmatprep.mubr.msk.f32.mxu0 %vm2772_vm0, %v2773_v6 }
  0x61   :  { %2367 = vmatmul.mubr.msk.f32.gmra.mrb[34].mxu0 %vm54_vm2, %v32_v38 }
  0x62   :  { %2369 = vmatprep.mubr.msk.f32.mxu0 %vm2772_vm0, %v2773_v6 }
  0x65   :  { %2370 = vmatmul.mubr.msk.f32.gmra.mrb[36].mxu0 %vm54_vm2, %v33_v39 }
  0x66   :  { %2372 = vmatprep.mubr.msk.f32.mxu0 %vm2772_vm0, %v2773_v6 }
  0x69   :  { %2373 = vmatmul.mubr.msk.f32.gmra.mrb[38].mxu0 %vm54_vm2, %v34_v40 }
  0x6a   :  { %2375 = vmatprep.mubr.msk.f32.mxu0 %vm2772_vm0, %v2773_v6 }
  0x6d   :  { %2376 = vmatmul.mubr.msk.f32.gmra.mrb[40].mxu0 %vm54_vm2, %v35_v41 }
  0x6e   :  { %2525 = vmatprep.mubr.msk.f32.mxu0 %vm2772_vm0, %v2773_v6 }
  0xf0   :  { %v188_v45 = vpop.f32.mrb[0].mxu0 }
  0xf1   :  { %v2317_v46 = vpop.f32.mrb[1].mxu0  ;;  %v189_v17 = vadd.f32 %v2984_v49, %v188_v45 }
  0xf2   :  { %v2652_v46 = vpack.c.bf16 %v600_v43, %v599_v42  ;;  %v891_v42 = vld [vmem:[%s3410_s1 + $0xd0] sm:$0xff] }
  0xf3   :  { %v292_v27 = vmax.f32 %v189_v17, 0.0  ;;  %v792_v17 = vld [vmem:[%s3410_s1 + $0xb8] sm:$0xff] }
  0xf4   :  { %v193_v47 = vpop.f32.mrb[2].mxu0 }
  0xf5   :  { %v2320_v48 = vpop.f32.mrb[3].mxu0  ;;  %v194_v28 = vadd.f32 %v2984_v49, %v193_v47 }
  0xf7   :  { %v293_v36 = vmax.f32 %v194_v28, 0.0 }
  0xf8   :  { %v198_v50 = vpop.f32.mrb[4].mxu0 }
  0xf9   :  { %v2987_v51 = vadd.f32 %v2984_v49, %v198_v50  ;;  %v2323_v52 = vpop.f32.mrb[5].mxu0 }
  0xfb   :  { %v294_v54 = vmax.f32 %v2987_v51, 0.0 }
  0xfc   :  { %v203_v53 = vpop.f32.mrb[6].mxu0 }
  0xfd   :  { %v204_v55 = vadd.f32 %v2984_v49, %v203_v53  ;;  %v2326_v56 = vpop.f32.mrb[7].mxu0  ;;  %v321_v61 = vrot.slane %v294_v54, 2 }
  0xfe   :  { %v698_v56 = vld [vmem:[%s3410_s1 + $0xa8] sm:$0xff] }
  0xff   :  { %v295_v59 = vmax.f32 %v204_v55, 0.0 }
 0x100   :  { %v208_v60 = vpop.f32.mrb[8].mxu0 }
 0x101   :  { %v322_v62 = vrot.slane %v295_v59, 2  ;;  %v209_v63 = vadd.f32 %v2984_v49, %v208_v60  ;;  %v2329_v0 = vpop.f32.mrb[9].mxu0 }
 0x103   :  { %v296_v2 = vmax.f32 %v209_v63, 0.0  ;;  %v323_v4 = vsel %vm320_vm3, %v321_v61, %v322_v62  ;;  %v2655_v61 = vpack.c.bf16 %v699_v57, %v698_v56 }
 0x104   :  { %v213_v5 = vpop.f32.mrb[10].mxu0  ;;  %2383 = vmatmul.mubr.msk.f32.vlgmr.msra.gmra.mrb[0].mxu1 %vm326_vm4, %v323_v4 }
 0x105   :  { %v324_v7 = vrot.slane %v296_v2, 2  ;;  %v214_v8 = vadd.f32 %v2984_v49, %v213_v5  ;;  %2647 = vmatpush3.bf16.msra.mxu1 %v2646_v1  ;;  %2385 = vmatprep.mubr.msk.f32.mxu1 %vm2772_vm0, %v2773_v6  ;;  %v2332_v9 = vpop.f32.mrb[11].mxu0  ;;  %v505_v13 = vrot.slane %v296_v2, 4 }
 0x106   :  { %2648 = vmatprep.subr.bf16.mxu1 %v2771_v3 }
 0x107   :  { %v297_v10 = vmax.f32 %v214_v8, 0.0  ;;  %v325_v11 = vsel %vm320_vm3, %v322_v62, %v324_v7 }
 0x108   :  { %2386 = vmatmul.mubr.msk.f32.gmra.mrb[2].mxu1 %vm326_vm4, %v325_v11  ;;  %v218_v12 = vpop.f32.mrb[12].mxu0 }
 0x109   :  { %v506_v14 = vrot.slane %v297_v10, 4  ;;  %2388 = vmatprep.mubr.msk.f32.mxu1 %vm2772_vm0, %v2773_v6  ;;  %v219_v15 = vadd.f32 %v2984_v49, %v218_v12  ;;  %v2335_v16 = vpop.f32.mrb[13].mxu0 }
 0x10b   :  { %v507_v20 = vsel %vm118_vm1, %v505_v13, %v506_v14  ;;  %v298_v21 = vmax.f32 %v219_v15, 0.0 }
 0x10c   :  { %2389 = vmatmul.mubr.msk.f32.gmra.mrb[4].mxu1 %vm326_vm4, %v324_v7  ;;  %v223_v22 = vpop.f32.mrb[14].mxu0 }
 0x10d   :  { %2395 = vmatprep.mubr.msk.f32.mxu1 %vm2772_vm0, %v2773_v6  ;;  %v508_v24 = vrot.slane %v298_v21, 4  ;;  %v224_v25 = vadd.f32 %v2984_v49, %v223_v22  ;;  %v2338_v26 = vpop.f32.mrb[15].mxu0  ;;  %v604_v29 = vrot.slane %v298_v21, 6  ;;  %v2658_v22 = vpack.c.bf16 %v793_v18, %v792_v17 }
 0x10f   :  { %v299_v30 = vmax.f32 %v224_v25, 0.0  ;;  %v509_v31 = vsel %vm118_vm1, %v506_v14, %v508_v24 }
 0x110   :  { %2396 = vmatmul.mubr.msk.f32.vlgmr.msra.gmra.mrb[6].mxu1 %vm326_vm4, %v292_v27  ;;  %v228_v32 = vpop.f32.mrb[16].mxu0 }
 0x111   :  { %2650 = vmatpush3.bf16.msra.mxu1 %v2649_v23  ;;  %2398 = vmatprep.mubr.msk.f32.mxu1 %vm2772_vm0, %v2773_v6  ;;  %v605_v33 = vrot.slane %v299_v30, 6  ;;  %v229_v34 = vadd.f32 %v2984_v49, %v228_v32  ;;  %v2341_v35 = vpop.f32.mrb[17].mxu0 }
 0x112   :  { %2651 = vmatprep.subr.bf16.mxu1 %v2771_v3 }
 0x113   :  { %v606_v37 = vsel %vm603_vm5, %v604_v29, %v605_v33  ;;  %v300_v38 = vmax.f32 %v229_v34, 0.0 }
 0x114   :  { %2399 = vmatmul.mubr.msk.f32.gmra.mrb[8].mxu1 %vm326_vm4, %v293_v36  ;;  %v233_v39 = vpop.f32.mrb[18].mxu0 }
 0x115   :  { %2401 = vmatprep.mubr.msk.f32.mxu1 %vm2772_vm0, %v2773_v6  ;;  %v607_v40 = vrot.slane %v300_v38, 6  ;;  %v2344_v41 = vpop.f32.mrb[19].mxu0  ;;  %v234_v16 = vadd.f32 %v2984_v49, %v233_v39 }
 0x116   :  { %v890_v41 = vld [vmem:[%s3410_s1 + $0xc8] sm:$0xff] }
 0x117   :  { %v608_v44 = vsel %vm603_vm5, %v605_v33, %v607_v40  ;;  %v301_v26 = vmax.f32 %v234_v16, 0.0 }
 0x118   :  { %2402 = vmatmul.mubr.msk.f32.gmra.mrb[10].mxu1 %vm326_vm4, %v294_v54  ;;  %v238_v45 = vpop.f32.mrb[20].mxu0 }
 0x119   :  { %2408 = vmatprep.mubr.msk.f32.mxu1 %vm2772_vm0, %v2773_v6  ;;  %v2347_v47 = vpop.f32.mrb[21].mxu0  ;;  %v239_v27 = vadd.f32 %v2984_v49, %v238_v45  ;;  %v2661_v45 = vpack.c.bf16 %v891_v42, %v890_v41 }
 0x11b   :  { %v302_v35 = vmax.f32 %v239_v27, 0.0 }
 0x11c   :  { %2409 = vmatmul.mubr.msk.f32.vlgmr.msra.gmra.mrb[12].mxu1 %vm326_vm4, %v507_v20  ;;  %v243_v48 = vpop.f32.mrb[22].mxu0 }
 0x11d   :  { %2653 = vmatpush3.bf16.msra.mxu1 %v2652_v46  ;;  %2411 = vmatprep.mubr.msk.f32.mxu1 %vm2772_vm0, %v2773_v6  ;;  %v3050_v50 = vadd.f32 %v2984_v49, %v243_v48  ;;  %v2350_v52 = vpop.f32.mrb[23].mxu0 }
 0x11e   :  { %2654 = vmatprep.subr.bf16.mxu1 %v2771_v3  ;;  %v989_v52 = vld [vmem:[%s3410_s1 + $0xe0] sm:$0xff] }
 0x11f   :  { %v303_v51 = vmax.f32 %v3050_v50, 0.0  ;;  %v988_v50 = vld [vmem:[%s3410_s1 + $0xd8] sm:$0xff] }
 0x120   :  { %2412 = vmatmul.mubr.msk.f32.gmra.mrb[14].mxu1 %vm326_vm4, %v509_v31  ;;  %v248_v53 = vpop.f32.mrb[24].mxu0 }
 0x121   :  { %2414 = vmatprep.mubr.msk.f32.mxu1 %vm2772_vm0, %v2773_v6  ;;  %v249_v54 = vadd.f32 %v2984_v49, %v248_v53  ;;  %v2353_v55 = vpop.f32.mrb[25].mxu0  ;;  %v796_v58 = vrot.slane %v303_v51, 2  ;;  %v1086_v53 = vld [vmem:[%s3410_s1 + $0xe8] sm:$0xff] }
 0x123   :  { %v304_v59 = vmax.f32 %v249_v54, 0.0  ;;  %v1087_v54 = vld [vmem:[%s3410_s1 + $0xf0] sm:$0xff] }
 0x124   :  { %2415 = vmatmul.mubr.msk.f32.gmra.mrb[16].mxu1 %vm326_vm4, %v508_v24  ;;  %v253_v60 = vpop.f32.mrb[26].mxu0  ;;  %v2667_v55 = vpack.c.bf16 %v1087_v54, %v1086_v53 }
 0x125   :  { %2421 = vmatprep.mubr.msk.f32.mxu1 %vm2772_vm0, %v2773_v6  ;;  %v797_v62 = vrot.slane %v304_v59, 2  ;;  %v254_v63 = vadd.f32 %v2984_v49, %v253_v60  ;;  %v2356_v0 = vpop.f32.mrb[27].mxu0 }
 0x126   :  { %v1348_v0 = vld [vmem:[%s3410_s1 + $0x148] sm:$0xff] }
 0x127   :  { %v798_v1 = vsel %vm320_vm3, %v796_v58, %v797_v62  ;;  %v305_v2 = vmax.f32 %v254_v63, 0.0 }
 0x128   :  { %2422 = vmatmul.mubr.msk.f32.vlgmr.msra.gmra.mrb[18].mxu1 %vm326_vm4, %v606_v37  ;;  %v258_v4 = vpop.f32.mrb[28].mxu0 }
 0x129   :  { %2656 = vmatpush3.bf16.msra.mxu1 %v2655_v61  ;;  %2424 = vmatprep.mubr.msk.f32.mxu1 %vm2772_vm0, %v2773_v6  ;;  %v3074_v5 = vrot.slane %v305_v2, 2  ;;  %v259_v7 = vadd.f32 %v2984_v49, %v258_v4  ;;  %v2359_v8 = vpop.f32.mrb[29].mxu0  ;;  %v894_v9 = vrot.slane %v305_v2, 4  ;;  %v1195_v4 = vld [vmem:[%s3410_s1 + $0x118] sm:$0xff] }
 0x12a   :  { %2657 = vmatprep.subr.bf16.mxu1 %v2771_v3  ;;  %v1197_v8 = vld [vmem:[%s3410_s1 + $0x128] sm:$0xff] }
 0x12b   :  { %v306_v10 = vmax.f32 %v259_v7, 0.0  ;;  %v800_v11 = vsel %vm320_vm3, %v797_v62, %v3074_v5  ;;  %v1346_v62 = vld [vmem:[%s3410_s1 + $0x138] sm:$0xff] }
 0x12c   :  { %2425 = vmatmul.mubr.msk.f32.gmra.mrb[20].mxu1 %vm326_vm4, %v608_v44  ;;  %v263_v12 = vpop.f32.mrb[30].mxu0 }
 0x12d   :  { %2427 = vmatprep.mubr.msk.f32.mxu1 %vm2772_vm0, %v2773_v6  ;;  %v895_v13 = vrot.slane %v306_v10, 4  ;;  %v264_v14 = vadd.f32 %v2984_v49, %v263_v12  ;;  %v2362_v15 = vpop.f32.mrb[31].mxu0 }
 0x12f   :  { %v896_v19 = vsel %vm118_vm1, %v894_v9, %v895_v13  ;;  %v307_v20 = vmax.f32 %v264_v14, 0.0  ;;  %v1198_v9 = vld [vmem:[%s3410_s1 + $0x130] sm:$0xff] }
 0x130   :  { %2428 = vmatmul.mubr.msk.f32.gmra.mrb[22].mxu1 %vm326_vm4, %v607_v40  ;;  %v268_v21 = vpop.f32.mrb[32].mxu0  ;;  %v2673_v10 = vpack.c.bf16 %v1198_v9, %v1197_v8 }
 0x131   :  { %2434 = vmatprep.mubr.msk.f32.mxu1 %vm2772_vm0, %v2773_v6  ;;  %v897_v23 = vrot.slane %v307_v20, 4  ;;  %v269_v24 = vadd.f32 %v2984_v49, %v268_v21  ;;  %v2365_v25 = vpop.f32.mrb[33].mxu0  ;;  %v992_v28 = vrot.slane %v307_v20, 6 }
 0x133   :  { %v308_v29 = vmax.f32 %v269_v24, 0.0  ;;  %v898_v30 = vsel %vm118_vm1, %v895_v13, %v897_v23 }
 0x134   :  { %2435 = vmatmul.mubr.msk.f32.vlgmr.msra.gmra.mrb[24].mxu1 %vm326_vm4, %v301_v26  ;;  %v273_v31 = vpop.f32.mrb[34].mxu0 }
 0x135   :  { %2659 = vmatpush3.bf16.msra.mxu1 %v2658_v22  ;;  %2437 = vmatprep.mubr.msk.f32.mxu1 %vm2772_vm0, %v2773_v6  ;;  %v993_v32 = vrot.slane %v308_v29, 6  ;;  %v274_v33 = vadd.f32 %v2984_v49, %v273_v31  ;;  %v2368_v34 = vpop.f32.mrb[35].mxu0 }
 0x136   :  { %2660 = vmatprep.subr.bf16.mxu1 %v2771_v3 }
 0x137   :  { %v994_v36 = vsel %vm603_vm5, %v992_v28, %v993_v32  ;;  %v309_v37 = vmax.f32 %v274_v33, 0.0 }
 0x138   :  { %2438 = vmatmul.mubr.msk.f32.gmra.mrb[26].mxu1 %vm326_vm4, %v302_v35  ;;  %v278_v38 = vpop.f32.mrb[36].mxu0 }
 0x139   :  { %2440 = vmatprep.mubr.msk.f32.mxu1 %vm2772_vm0, %v2773_v6  ;;  %v995_v39 = vrot.slane %v309_v37, 6  ;;  %v2371_v40 = vpop.f32.mrb[37].mxu0  ;;  %v279_v56 = vadd.f32 %v2984_v49, %v278_v38 }
 0x13b   :  { %v996_v43 = vsel %vm603_vm5, %v993_v32, %v995_v39  ;;  %v310_v57 = vmax.f32 %v279_v56, 0.0 }
 0x13c   :  { %2441 = vmatmul.mubr.msk.f32.gmra.mrb[28].mxu1 %vm326_vm4, %v303_v51  ;;  %v283_v44 = vpop.f32.mrb[38].mxu0  ;;  %v2664_v51 = vpack.c.bf16 %v989_v52, %v988_v50 }
 0x13d   :  { %2447 = vmatprep.mubr.msk.f32.mxu1 %vm2772_vm0, %v2773_v6  ;;  %v2374_v46 = vpop.f32.mrb[39].mxu0  ;;  %v284_v58 = vadd.f32 %v2984_v49, %v283_v44 }
 0x13f   :  { %v311_v59 = vmax.f32 %v284_v58, 0.0 }
 0x140   :  { %2448 = vmatmul.mubr.msk.f32.vlgmr.msra.gmra.mrb[30].mxu1 %vm326_vm4, %v798_v1  ;;  %v288_v47 = vpop.f32.mrb[40].mxu0  ;;  %v1349_v1 = vld [vmem:[%s3410_s1 + $0x150] sm:$0xff] }
 0x141   :  { %2662 = vmatpush3.bf16.msra.mxu1 %v2661_v45  ;;  %2450 = vmatprep.mubr.msk.f32.mxu1 %vm2772_vm0, %v2773_v6  ;;  %v2377_v48 = vpop.f32.mrb[41].mxu0  ;;  %v289_v60 = vadd.f32 %v2984_v49, %v288_v47  ;;  %v1347_v49 = vld [vmem:[%s3410_s1 + $0x140] sm:$0xff]  ;;  %v2685_v2 = vpack.c.bf16 %v1349_v1, %v1348_v0 }
 0x142   :  { %2663 = vmatprep.subr.bf16.mxu1 %v2771_v3  ;;  %v2682_v63 = vpack.c.bf16 %v1347_v49, %v1346_v62 }
 0x143   :  { %v312_v61 = vmax.f32 %v289_v60, 0.0 }
 0x144   :  { %2451 = vmatmul.mubr.msk.f32.gmra.mrb[32].mxu1 %vm326_vm4, %v800_v11  ;;  %2683 = vmatpush3.bf16.msra.mxu0 %v2682_v63 }
 0x145   :  { %2453 = vmatprep.mubr.msk.f32.mxu1 %vm2772_vm0, %v2773_v6  ;;  %2684 = vmatprep.subr.bf16.mxu0 %v2771_v3 }
 0x148   :  { %2454 = vmatmul.mubr.msk.f32.gmra.mrb[34].mxu1 %vm326_vm4, %v3074_v5  ;;  %2686 = vmatpush3.bf16.msra.mxu0 %v2685_v2  ;;  %v1196_v5 = vld [vmem:[%s3410_s1 + $0x120] sm:$0xff] }
 0x149   :  { %2460 = vmatprep.mubr.msk.f32.mxu1 %vm2772_vm0, %v2773_v6  ;;  %2693 = vmatprep.subr.bf16.mxu0 %v2771_v3  ;;  %v2670_v7 = vpack.c.bf16 %v1196_v5, %v1195_v4 }
 0x14c   :  { %2461 = vmatmul.mubr.msk.f32.vlgmr.msra.gmra.mrb[36].mxu1 %vm326_vm4, %v896_v19 }
 0x14d   :  { %2665 = vmatpush3.bf16.msra.mxu1 %v2664_v51  ;;  %2463 = vmatprep.mubr.msk.f32.mxu1 %vm2772_vm0, %v2773_v6 }
 0x14e   :  { %2666 = vmatprep.subr.bf16.mxu1 %v2771_v3 }
 0x150   :  { %2464 = vmatmul.mubr.msk.f32.gmra.mrb[38].mxu1 %vm326_vm4, %v898_v30 }
 0x151   :  { %2466 = vmatprep.mubr.msk.f32.mxu1 %vm2772_vm0, %v2773_v6 }
 0x154   :  { %2467 = vmatmul.mubr.msk.f32.gmra.mrb[40].mxu1 %vm326_vm4, %v897_v23 }
 0x155   :  { %2473 = vmatprep.mubr.msk.f32.mxu1 %vm2772_vm0, %v2773_v6 }
 0x158   :  { %2474 = vmatmul.mubr.msk.f32.vlgmr.msra.gmra.mrb[42].mxu1 %vm326_vm4, %v994_v36 }
 0x159   :  { %2668 = vmatpush3.bf16.msra.mxu1 %v2667_v55  ;;  %2476 = vmatprep.mubr.msk.f32.mxu1 %vm2772_vm0, %v2773_v6 }
 0x15a   :  { %2669 = vmatprep.subr.bf16.mxu1 %v2771_v3 }
 0x15c   :  { %2477 = vmatmul.mubr.msk.f32.gmra.mrb[44].mxu1 %vm326_vm4, %v996_v43 }
 0x15d   :  { %2479 = vmatprep.mubr.msk.f32.mxu1 %vm2772_vm0, %v2773_v6 }
 0x160   :  { %2480 = vmatmul.mubr.msk.f32.gmra.mrb[46].mxu1 %vm326_vm4, %v995_v39 }
 0x161   :  { %2486 = vmatprep.mubr.msk.f32.mxu1 %vm2772_vm0, %v2773_v6 }
 0x164   :  { %2487 = vmatmul.mubr.msk.f32.vlgmr.msra.gmra.mrb[48].mxu1 %vm326_vm4, %v310_v57 }
 0x165   :  { %2489 = vmatprep.mubr.msk.f32.mxu1 %vm2772_vm0, %v2773_v6  ;;  %2671 = vmatpush3.bf16.msra.mxu1 %v2670_v7 }
 0x166   :  { %2672 = vmatprep.subr.bf16.mxu1 %v2771_v3 }
 0x168   :  { %2490 = vmatmul.mubr.msk.f32.gmra.mrb[50].mxu1 %vm326_vm4, %v311_v59 }
 0x169   :  { %2492 = vmatprep.mubr.msk.f32.mxu1 %vm2772_vm0, %v2773_v6  ;;  %2674 = vmatpush3.bf16.msra.mxu1 %v2673_v10 }
 0x16a   :  { %2675 = vmatprep.subr.bf16.mxu1 %v2771_v3 }
 0x16c   :  { %2493 = vmatmul.mubr.msk.f32.gmra.mrb[52].mxu1 %vm326_vm4, %v312_v61 }
 0x16d   :  { %2503 = vmatprep.mubr.msk.f32.mxu1 %vm2772_vm0, %v2773_v6 }
 0x1d7   :  { %v399_v11 = vpop.f32.mrb[0].mxu1 }
 0x1d8   :  { %v2384_v12 = vpop.f32.mrb[1].mxu1 }
 0x1db   :  { %v404_v13 = vpop.f32.mrb[2].mxu1 }
 0x1dc   :  { %v2387_v14 = vpop.f32.mrb[3].mxu1 }
 0x1df   :  { %v409_v15 = vpop.f32.mrb[4].mxu1 }
 0x1e0   :  { %v2390_v16 = vpop.f32.mrb[5].mxu1 }
 0x1e3   :  { %v487_v17 = vpop.f32.mrb[6].mxu1 }
 0x1e4   :  { %v488_v18 = vadd.f32 %v487_v17, %v399_v11  ;;  %v2397_v19 = vpop.f32.mrb[7].mxu1 }
 0x1e5   :  { %v3205_v19 = vld [vmem:[%s3411_s2 + $0x1] ss:$0 sm:$0xff] }
 0x1e7   :  { %v492_v20 = vpop.f32.mrb[8].mxu1 }
 0x1e8   :  { %v493_v21 = vadd.f32 %v492_v20, %v404_v13  ;;  %v2400_v22 = vpop.f32.mrb[9].mxu1 }
 0x1e9   :  { %v1191_v22 = vld [vmem:[%s3410_s1 + $0xf8] sm:$0xff] }
 0x1eb   :  { %v497_v23 = vpop.f32.mrb[10].mxu1 }
 0x1ec   :  { %v498_v24 = vadd.f32 %v497_v23, %v409_v15  ;;  %v2403_v25 = vpop.f32.mrb[11].mxu1 }
 0x1ed   :  { %v1502_v25 = vld [vmem:[%s3410_s1 + $0x178] sm:$0xff] }
 0x1ef   :  { %v582_v26 = vpop.f32.mrb[12].mxu1 }
 0x1f0   :  { %v596_v27 = vadd.f32 %v582_v26, %v488_v18  ;;  %v2410_v28 = vpop.f32.mrb[13].mxu1  ;;  %v1503_v26 = vld [vmem:[%s3410_s1 + $0x180] sm:$0xff] }
 0x1f3   :  { %v587_v29 = vpop.f32.mrb[14].mxu1 }
 0x1f4   :  { %v597_v30 = vadd.f32 %v587_v29, %v493_v21  ;;  %v2413_v31 = vpop.f32.mrb[15].mxu1 }
 0x1f7   :  { %v592_v32 = vpop.f32.mrb[16].mxu1 }
 0x1f8   :  { %v598_v33 = vadd.f32 %v592_v32, %v498_v24  ;;  %v2416_v34 = vpop.f32.mrb[17].mxu1  ;;  %v1192_v24 = vld [vmem:[%s3410_s1 + $0x100] sm:$0xff]  ;;  %v2694_v32 = vpack.c.bf16 %v1503_v26, %v1502_v25  ;;  %v1982_v25 = vld [vmem:[%s3410_s1 + $0x238] sm:$0xff] }
 0x1f9   :  { %v2676_v31 = vpack.c.bf16 %v1192_v24, %v1191_v22  ;;  %v1983_v26 = vld [vmem:[%s3410_s1 + $0x240] sm:$0xff] }
 0x1fb   :  { %v681_v35 = vpop.f32.mrb[18].mxu1 }
 0x1fc   :  { %v695_v36 = vadd.f32 %v681_v35, %v596_v27  ;;  %v2423_v37 = vpop.f32.mrb[19].mxu1 }
 0x1fd   :  { %v1504_v37 = vld [vmem:[%s3410_s1 + $0x188] sm:$0xff] }
 0x1ff   :  { %v686_v38 = vpop.f32.mrb[20].mxu1 }
 0x200   :  { %v696_v39 = vadd.f32 %v686_v38, %v597_v30  ;;  %v2426_v40 = vpop.f32.mrb[21].mxu1  ;;  %v1505_v38 = vld [vmem:[%s3410_s1 + $0x190] sm:$0xff] }
 0x203   :  { %v691_v41 = vpop.f32.mrb[22].mxu1 }
 0x204   :  { %v697_v42 = vadd.f32 %v691_v41, %v598_v33  ;;  %v2429_v43 = vpop.f32.mrb[23].mxu1  ;;  %v1193_v33 = vld [vmem:[%s3410_s1 + $0x108] sm:$0xff] }
 0x205   :  { %v2697_v43 = vpack.c.bf16 %v1505_v38, %v1504_v37 }
 0x207   :  { %v775_v44 = vpop.f32.mrb[24].mxu1 }
 0x208   :  { %v789_v45 = vadd.f32 %v775_v44, %v695_v36  ;;  %v2436_v46 = vpop.f32.mrb[25].mxu1  ;;  %v1194_v36 = vld [vmem:[%s3410_s1 + $0x110] sm:$0xff]  ;;  %v1424_v44 = vld [vmem:[%s3410_s1 + $0x158] sm:$0xff] }
 0x209   :  { %v1425_v46 = vld [vmem:[%s3410_s1 + $0x160] sm:$0xff] }
 0x20b   :  { %v780_v47 = vpop.f32.mrb[26].mxu1 }
 0x20c   :  { %v790_v48 = vadd.f32 %v780_v47, %v696_v39  ;;  %v2439_v50 = vpop.f32.mrb[27].mxu1  ;;  %v1658_v47 = vld [vmem:[%s3410_s1 + $0x1b8] sm:$0xff] }
 0x20d   :  { %v2688_v50 = vpack.c.bf16 %v1425_v46, %v1424_v44 }
 0x20f   :  { %v785_v52 = vpop.f32.mrb[28].mxu1 }
 0x210   :  { %v791_v51 = vadd.f32 %v785_v52, %v697_v42  ;;  %v2442_v53 = vpop.f32.mrb[29].mxu1  ;;  %v2679_v42 = vpack.c.bf16 %v1194_v36, %v1193_v33 }
 0x213   :  { %v873_v54 = vpop.f32.mrb[30].mxu1 }
 0x214   :  { %v887_v55 = vadd.f32 %v873_v54, %v789_v45  ;;  %v2449_v56 = vpop.f32.mrb[31].mxu1  ;;  %v1427_v54 = vld [vmem:[%s3410_s1 + $0x170] sm:$0xff] }
 0x215   :  { %v1661_v56 = vld [vmem:[%s3410_s1 + $0x1d0] sm:$0xff] }
 0x217   :  { %v878_v57 = vpop.f32.mrb[32].mxu1 }
 0x218   :  { %v888_v58 = vadd.f32 %v878_v57, %v790_v48  ;;  %v2452_v59 = vpop.f32.mrb[33].mxu1  ;;  %v1659_v48 = vld [vmem:[%s3410_s1 + $0x1c0] sm:$0xff] }
 0x219   :  { %v2706_v52 = vpack.c.bf16 %v1659_v48, %v1658_v47  ;;  %v1580_v59 = vld [vmem:[%s3410_s1 + $0x198] sm:$0xff] }
 0x21b   :  { %v883_v60 = vpop.f32.mrb[34].mxu1 }
 0x21c   :  { %v889_v61 = vadd.f32 %v883_v60, %v791_v51  ;;  %v2455_v62 = vpop.f32.mrb[35].mxu1  ;;  %v1426_v51 = vld [vmem:[%s3410_s1 + $0x168] sm:$0xff]  ;;  %v1581_v60 = vld [vmem:[%s3410_s1 + $0x1a0] sm:$0xff] }
 0x21d   :  { %v2691_v57 = vpack.c.bf16 %v1427_v54, %v1426_v51  ;;  %v1815_v62 = vld [vmem:[%s3410_s1 + $0x200] sm:$0xff] }
 0x21f   :  { %v971_v49 = vpop.f32.mrb[36].mxu1 }
 0x220   :  { %v985_v63 = vadd.f32 %v971_v49, %v887_v55  ;;  %v2462_v0 = vpop.f32.mrb[37].mxu1  ;;  %v1660_v55 = vld [vmem:[%s3410_s1 + $0x1c8] sm:$0xff]  ;;  %v2700_v49 = vpack.c.bf16 %v1581_v60, %v1580_v59  ;;  %v2146_v59 = vld [vmem:[%s3411_s2 + $0x2] ss:$0 sm:$0xff] }
 0x221   :  { %v1582_v0 = vld [vmem:[%s3410_s1 + $0x1a8] sm:$0xff] }
 0x223   :  { %v976_v1 = vpop.f32.mrb[38].mxu1 }
 0x224   :  { %v986_v2 = vadd.f32 %v976_v1, %v888_v58  ;;  %v2465_v4 = vpop.f32.mrb[39].mxu1  ;;  %v2709_v58 = vpack.c.bf16 %v1661_v56, %v1660_v55 }
 0x225   :  { %v1583_v4 = vld [vmem:[%s3410_s1 + $0x1b0] sm:$0xff] }
 0x227   :  { %v981_v5 = vpop.f32.mrb[40].mxu1 }
 0x228   :  { %v987_v7 = vadd.f32 %v981_v5, %v889_v61  ;;  %v2468_v8 = vpop.f32.mrb[41].mxu1  ;;  %v1814_v61 = vld [vmem:[%s3410_s1 + $0x1f8] sm:$0xff]  ;;  %v1816_v5 = vld [vmem:[%s3410_s1 + $0x208] sm:$0xff] }
 0x229   :  { %v2703_v8 = vpack.c.bf16 %v1583_v4, %v1582_v0 }
 0x22b   :  { %v1069_v9 = vpop.f32.mrb[42].mxu1 }
 0x22c   :  { %v1083_v10 = vadd.f32 %v1069_v9, %v985_v63  ;;  %v2475_v11 = vpop.f32.mrb[43].mxu1  ;;  %v2718_v63 = vpack.c.bf16 %v1815_v62, %v1814_v61 }
 0x22d   :  { %v1736_v11 = vld [vmem:[%s3410_s1 + $0x1d8] sm:$0xff] }
 0x22f   :  { %v1074_v12 = vpop.f32.mrb[44].mxu1 }
 0x230   :  { %v1084_v13 = vadd.f32 %v1074_v12, %v986_v2  ;;  %v2478_v14 = vpop.f32.mrb[45].mxu1  ;;  %v1737_v12 = vld [vmem:[%s3410_s1 + $0x1e0] sm:$0xff] }
 0x233   :  { %v1079_v15 = vpop.f32.mrb[46].mxu1 }
 0x234   :  { %v1085_v16 = vadd.f32 %v1079_v15, %v987_v7  ;;  %v2481_v17 = vpop.f32.mrb[47].mxu1  ;;  %v1817_v7 = vld [vmem:[%s3410_s1 + $0x210] sm:$0xff] }
 0x235   :  { %v2721_v9 = vpack.c.bf16 %v1817_v7, %v1816_v5  ;;  %v1739_v17 = vld [vmem:[%s3410_s1 + $0x1f0] sm:$0xff] }
 0x237   :  { %v1163_v18 = vpop.f32.mrb[48].mxu1 }
 0x238   :  { %v1177_v20 = vadd.f32 %v1163_v18, %v1083_v10  ;;  %v2488_v21 = vpop.f32.mrb[49].mxu1 }
 0x239   :  { %v1900_v21 = vld [vmem:[%s3410_s1 + $0x220] sm:$0xff] }
 0x23a   :  { %v1185_v23 = vadd.f32 %v3205_v19, %v1177_v20  ;;  %v1899_v20 = vld [vmem:[%s3410_s1 + $0x218] sm:$0xff] }
 0x23b   :  { %v1168_v27 = vpop.f32.mrb[50].mxu1  ;;  %v2724_v22 = vpack.c.bf16 %v1900_v21, %v1899_v20 }
 0x23c   :  { %v3220_v28 = vmax.f32 %v1185_v23, 0.0  ;;  %v1178_v29 = vadd.f32 %v1168_v27, %v1084_v13  ;;  %v2491_v30 = vpop.f32.mrb[51].mxu1  ;;  %v2712_v13 = vpack.c.bf16 %v1737_v12, %v1736_v11  ;;  %v1901_v23 = vld [vmem:[%s3410_s1 + $0x228] sm:$0xff] }
 0x23d   :  { %v1984_v27 = vld [vmem:[%s3410_s1 + $0x248] sm:$0xff] }
 0x23e   :  { %v1200_v34 = vrot.slane %v3220_v28, 2  ;;  %v1350_v35 = vrot.slane %v3220_v28, 4  ;;  %v1186_v45 = vadd.f32 %v3205_v19, %v1178_v29  ;;  %v1428_v1 = vrot.slane %v3220_v28, 6  ;;  %v1985_v29 = vld [vmem:[%s3410_s1 + $0x250] sm:$0xff] }
 0x23f   :  { %v1173_v39 = vpop.f32.mrb[52].mxu1  ;;  %v2733_v30 = vpack.c.bf16 %v1985_v29, %v1984_v27 }
 0x240   :  { %v1179_v40 = vadd.f32 %v1173_v39, %v1085_v16  ;;  %2504 = vmatmul.mubr.msk.f32.vlgmr.msra.gmra.mrb[54].mxu1 %vm1201_vm6, %v1200_v34  ;;  %2526 = vmatmul.mubr.msk.f32.vlgmr.msra.gmra.mrb[42].mxu0 %vm1201_vm6, %v1350_v35  ;;  %v2494_v41 = vpop.f32.mrb[53].mxu1  ;;  %v3260_v53 = vmax.f32 %v1186_v45, 0.0  ;;  %v1738_v16 = vld [vmem:[%s3410_s1 + $0x1e8] sm:$0xff] }
 0x241   :  { %2677 = vmatpush3.bf16.msra.mxu1 %v2676_v31  ;;  %2695 = vmatpush3.bf16.msra.mxu0 %v2694_v32  ;;  %v2715_v18 = vpack.c.bf16 %v1739_v17, %v1738_v16  ;;  %v1986_v31 = vld [vmem:[%s3410_s1 + $0x258] sm:$0xff]  ;;  %v1987_v32 = vld [vmem:[%s3410_s1 + $0x260] sm:$0xff] }
 0x242   :  { %2678 = vmatprep.subr.bf16.mxu1 %v2771_v3  ;;  %2696 = vmatprep.subr.bf16.mxu0 %v2771_v3  ;;  %v1662_v2 = vrot.slane %v3260_v53, 4  ;;  %v1187_v10 = vadd.f32 %v3205_v19, %v1179_v40  ;;  %v1584_v14 = vrot.slane %v3260_v53, 2  ;;  %v1740_v19 = vrot.slane %v3260_v53, 6 }
 0x243   :  { %2514 = vmatprep.mubr.msk.f32.mxu1 %vm2772_vm0, %v2773_v6  ;;  %2547 = vmatprep.mubr.msk.f32.mxu0 %vm2772_vm0, %v2773_v6  ;;  %v2736_v33 = vpack.c.bf16 %v1987_v32, %v1986_v31 }
 0x244   :  { %v1190_v15 = vmax.f32 %v1187_v10, 0.0 }
 0x245   :  { %2680 = vmatpush3.bf16.msra.mxu1 %v2679_v42  ;;  %2698 = vmatpush3.bf16.msra.mxu0 %v2697_v43 }
 0x246   :  { %2687 = vmatprep.subr.bf16.mxu1 %v2771_v3  ;;  %2705 = vmatprep.subr.bf16.mxu0 %v2771_v3 }
 0x248   :  { %2515 = vmatmul.mubr.msk.f32.vlgmr.msra.gmra.mrb[56].mxu1 %vm1201_vm6, %v3220_v28  ;;  %2548 = vmatmul.mubr.msk.f32.vlgmr.msra.gmra.mrb[44].mxu0 %vm1201_vm6, %v3260_v53  ;;  %v2730_v28 = vpack.c.bf16 %v1983_v26, %v1982_v25 }
 0x249   :  { %2689 = vmatpush3.bf16.msra.mxu1 %v2688_v50  ;;  %2707 = vmatpush3.bf16.msra.mxu0 %v2706_v52 }
 0x24a   :  { %2690 = vmatprep.subr.bf16.mxu1 %v2771_v3  ;;  %2708 = vmatprep.subr.bf16.mxu0 %v2771_v3 }
 0x24b   :  { %2536 = vmatprep.mubr.msk.f32.mxu1 %vm2772_vm0, %v2773_v6  ;;  %2569 = vmatprep.mubr.msk.f32.mxu0 %vm2772_vm0, %v2773_v6 }
 0x24d   :  { %2692 = vmatpush3.bf16.msra.mxu1 %v2691_v57  ;;  %2710 = vmatpush3.bf16.msra.mxu0 %v2709_v58 }
 0x24e   :  { %2699 = vmatprep.subr.bf16.mxu1 %v2771_v3  ;;  %2717 = vmatprep.subr.bf16.mxu0 %v2771_v3 }
 0x250   :  { %2537 = vmatmul.mubr.msk.f32.vlgmr.msra.gmra.mrb[58].mxu1 %vm1201_vm6, %v1428_v1  ;;  %2570 = vmatmul.mubr.msk.f32.vlgmr.msra.gmra.mrb[46].mxu0 %vm1201_vm6, %v1662_v2  ;;  %v2147_v1 = vld [vmem:[%s3411_s2 + $0x3] ss:$0 sm:$0xff] }
 0x251   :  { %2701 = vmatpush3.bf16.msra.mxu1 %v2700_v49  ;;  %2719 = vmatpush3.bf16.msra.mxu0 %v2718_v63  ;;  %v1988_v49 = vld [vmem:[%s3410_s1 + $0x268] sm:$0xff]  ;;  %v1989_v63 = vld [vmem:[%s3410_s1 + $0x270] sm:$0xff] }
 0x252   :  { %2702 = vmatprep.subr.bf16.mxu1 %v2771_v3  ;;  %2720 = vmatprep.subr.bf16.mxu0 %v2771_v3  ;;  %v2739_v0 = vpack.c.bf16 %v1989_v63, %v1988_v49 }
 0x253   :  { %2558 = vmatprep.mubr.msk.f32.mxu1 %vm2772_vm0, %v2773_v6  ;;  %2591 = vmatprep.mubr.msk.f32.mxu0 %vm2772_vm0, %v2773_v6 }
 0x255   :  { %2704 = vmatpush3.bf16.msra.mxu1 %v2703_v8  ;;  %2722 = vmatpush3.bf16.msra.mxu0 %v2721_v9  ;;  %v2149_v8 = vld [vmem:[%s3411_s2 + $0x4] ss:$0 sm:$0xff] }
 0x256   :  { %2711 = vmatprep.subr.bf16.mxu1 %v2771_v3  ;;  %2729 = vmatprep.subr.bf16.mxu0 %v2771_v3 }
 0x258   :  { %2559 = vmatmul.mubr.msk.f32.vlgmr.msra.gmra.mrb[60].mxu1 %vm1201_vm6, %v1584_v14  ;;  %2592 = vmatmul.mubr.msk.f32.vlgmr.msra.gmra.mrb[48].mxu0 %vm1201_vm6, %v1190_v15 }
 0x259   :  { %2713 = vmatpush3.bf16.msra.mxu1 %v2712_v13  ;;  %2580 = vmatprep.mubr.msk.f32.mxu1 %vm2772_vm0, %v2773_v6 }
 0x25a   :  { %2714 = vmatprep.subr.bf16.mxu1 %v2771_v3  ;;  %2621 = vmatprep.mubr.msk.f32.mxu0 %vm2772_vm0, %v2773_v6 }
 0x25b   :  { %2731 = vmatpush3.bf16.msra.mxu0 %v2730_v28 }
 0x25c   :  { %2732 = vmatprep.subr.bf16.mxu0 %v2771_v3 }
 0x25d   :  { %2716 = vmatpush3.bf16.msra.mxu1 %v2715_v18 }
 0x25e   :  { %2723 = vmatprep.subr.bf16.mxu1 %v2771_v3 }
 0x25f   :  { %2734 = vmatpush3.bf16.msra.mxu0 %v2733_v30 }
 0x260   :  { %2581 = vmatmul.mubr.msk.f32.vlgmr.msra.gmra.mrb[62].mxu1 %vm1201_vm6, %v1740_v19  ;;  %2735 = vmatprep.subr.bf16.mxu0 %v2771_v3 }
 0x261   :  { %2602 = vmatprep.mubr.msk.f32.mxu1 %vm2772_vm0, %v2773_v6  ;;  %2725 = vmatpush3.bf16.msra.mxu1 %v2724_v22  ;;  %v1902_v6 = vld [vmem:[%s3410_s1 + $0x230] sm:$0xff]  ;;  %s2774_s1 = smov [#allocation2]  }
 0x262   :  { %2726 = vmatprep.subr.bf16.mxu1 %v2771_v3  ;;  %v2727_v24 = vpack.c.bf16 %v1902_v6, %v1901_v23  ;;  %s2078_s28 = sshll.u32 %s2774_s1, 4  ;;  %s2079_s28 = int_to_ptr.vmem [resolvable:$true] %s2078_s28 }
 0x263   :  { %2737 = vmatpush3.bf16.msra.mxu0 %v2736_v33  ;;  %s2747_s29 = scalar_lea.vmem %s2079_s28, 32  ;;  %p2752_p1 = scmp.lt.s32.totalorder %s2079_s28, %s2079_s28 }
 0x264   :  { %2738 = vmatprep.subr.bf16.mxu0 %v2771_v3  ;;  %p2748_p0 = scmp.ne.s32.totalorder %s2079_s28, %s2747_s29  ;;  %p2753_p2 = scmp.lt.s32.totalorder %s2747_s29, %s2747_s29 }
 0x265   :  { %2728 = vmatpush3.bf16.msra.mxu1 %v2727_v24 }
 0x266   :  { %p2754_p3 = por %p2753_p2, %p2752_p1 }
 0x267   :  { %2740 = vmatpush3.bf16.msra.mxu0 %v2739_v0 }
 0x268   :  { %p2755_p4 = pnand %p2754_p3, %p2748_p0 }
 0x313   :  { %v1270_v34 = vpop.f32.mrb[54].mxu1  ;;  %v1419_v35 = vpop.f32.mrb[42].mxu0 }
 0x314   :  { %v2505_v36 = vpop.f32.mrb[55].mxu1  ;;  %v2527_v37 = vpop.f32.mrb[43].mxu0 }
 0x31b   :  { %v1342_v38 = vpop.f32.mrb[56].mxu1  ;;  %v1575_v39 = vpop.f32.mrb[44].mxu0 }
 0x31c   :  { %v1343_v40 = vadd.f32 %v1342_v38, %v1270_v34  ;;  %v2516_v41 = vpop.f32.mrb[57].mxu1  ;;  %v2549_v42 = vpop.f32.mrb[45].mxu0 }
 0x31e   :  { %v1423_v43 = vadd.f32 %v1419_v35, %v1343_v40 }
 0x323   :  { %v1497_v44 = vpop.f32.mrb[58].mxu1  ;;  %v1731_v45 = vpop.f32.mrb[46].mxu0 }
 0x324   :  { %v1501_v46 = vadd.f32 %v1497_v44, %v1423_v43  ;;  %v2538_v47 = vpop.f32.mrb[59].mxu1  ;;  %v2571_v48 = vpop.f32.mrb[47].mxu0 }
 0x326   :  { %v1579_v50 = vadd.f32 %v1575_v39, %v1501_v46 }
 0x32b   :  { %v1653_v52 = vpop.f32.mrb[60].mxu1  ;;  %v1887_v51 = vpop.f32.mrb[48].mxu0 }
 0x32c   :  { %v1657_v53 = vadd.f32 %v1653_v52, %v1579_v50  ;;  %v2560_v3 = vpop.f32.mrb[61].mxu1  ;;  %v2593_v54 = vpop.f32.mrb[49].mxu0 }
 0x32e   :  { %v1735_v55 = vadd.f32 %v1731_v45, %v1657_v53 }
 0x333   :  { %v1809_v56 = vpop.f32.mrb[62].mxu1 }
 0x334   :  { %v1813_v57 = vadd.f32 %v1809_v56, %v1735_v55  ;;  %v2582_v58 = vpop.f32.mrb[63].mxu1 }
 0x336   :  { %v1891_v60 = vadd.f32 %v1887_v51, %v1813_v57 }
 0x338   :  { %v1897_v61 = vadd.f32 %v2146_v59, %v1891_v60 }
 0x33a   :  { %v1898_v62 = vmax.f32 %v1897_v61, 0.0 }
 0x33c   :  { %2603 = vmatmul.mubr.msk.f32.vlgmr.msra.gmra.mrb[64].mxu1 %vm1201_vm6, %v1898_v62 }
 0x40f   :  { %v1977_v2 = vpop.f32.mrb[64].mxu1 }
 0x410   :  { %v1978_v4 = vadd.f32 %v2147_v1, %v1977_v2  ;;  %v2604_v5 = vpop.f32.mrb[65].mxu1 }
 0x412   :  { %v1981_v7 = vmax.f32 %v1978_v4, 0.0 }
 0x414   :  { %2622 = vmatmul.mubr.msk.f32.vlgmr.msra.gmra.mrb[50].mxu0 %vm1995_vm7, %v1981_v7 }
 0x4e7   :  { %v2065_v9 = vpop.f32.mrb[50].mxu0 }
 0x4e8   :  { %v2066_v10 = vadd.f32 %v2149_v8, %v2065_v9  ;;  %v2623_v11 = vpop.f32.mrb[51].mxu0 }
 0x4ea   :  { %2745 = vtanh.f32 %v2066_v10 }
 0x4f4   :  { %v2746_v12 = vpop.eup %2745 }
 0x4f5   :  { %2071 = vst.msk [vmem:[#allocation2] sm:$0x3] %vm2070_vm8, %v2746_v12 }
 0x4f6   :  { %2758 = shalt.err (!%p2755_p4)
}
 0x4f7   :  { %s2759_s2 = scalar_lea.hbm %s3412_s3, 32 }
 0x4f8   :  { %p2760_p5 = scmp.ne.s32.totalorder %s3412_s3, %s2759_s2  ;;  %p2763_p6 = scmp.lt.u32.totalorder %s2759_s2, %s3412_s3 }
 0x4fa   :  { %p2765_p7 = pnand %p2763_p6, %p2760_p5 }
 0x4fc   :  { %2768 = shalt.err (!%p2765_p7)
}
 0x4fd   :  { %2081 = dma.vmem_to_hbm [thread:$0]  %s2079_s28, 32, %s3412_s3, [#allocation3]  }
 0x4fe   :  { %2769 = dma.done.wait [#allocation3], 32  }
 0x4ff   :  { %2770 = vsyncadd [#allocation3], 4294967264 }
 0x500   :  { %2085 = vsyncpa [#allocation3], 1 }

</bundles_post_ra>
